<compile_context>
chip_gen: v6e
topology: v6e:2x2x1
jax: 0.10.0
libtpu: 0.0.40
codegen_flags: <defaults>
</compile_context>

<pallas_src>
import functools

import jax
import jax.numpy as jnp
from jax.experimental import pallas as pl
from jax.experimental.pallas import tpu as pltpu

LANES = 128
N_SPLIT = 2                             # leading "parallel" axis (2 TCs on v7x)
MAX_STEP_HBM_BYTES = 8 * 1024 * 1024    # total input bytes fetched per grid step
VMEM_LIMIT_CAP = 32 * 1024 * 1024       # scoped VMEM we request (<= physical/2 everywhere)


def _round_up(x, m):
    return ((x + m - 1) // m) * m


def _sublane(dtype):
    # Packed dtypes need more sublanes per (sub, 128) tile: f32->8, bf16->16, int8->32.
    itemsize = jnp.dtype(dtype).itemsize
    return max(8, 32 // max(itemsize, 1))


def _grid_cell_loss_kernel(g_ref, t_ref, out_ref, acc_ref, *,
                           tile_rows, tiles_per_split, valid_rows, needs_mask):
    c = pl.program_id(0)   # parallel split (megacore axis)
    k = pl.program_id(1)   # sequential tiles within this split

    @pl.when(k == 0)
    def _():
        acc_ref[...] = jnp.zeros_like(acc_ref)

    # Cast inside the kernel (VPU has huge slack here); f32 accumulation.
    d = g_ref[...].astype(jnp.float32) - t_ref[...].astype(jnp.float32)
    groups = tile_rows // 8

    def accumulate(x):
        # (tile_rows, 128) -> (groups, 8, 128); summing axis 0 is pure
        # vreg-wise VPU adds (no XLU), folded into a single-vreg accumulator.
        acc_ref[...] += x.reshape(groups, 8, LANES).sum(axis=0)

    if needs_mask:
        # Nominal (pre-clamp) tile index decides validity; rows past the real
        # data (Pallas-padded tails / clamped re-reads) are zeroed out. Only
        # boundary / overflow tiles pay the mask cost.
        tile_idx = c * tiles_per_split + k
        fully_valid = (tile_idx + 1) * tile_rows <= valid_rows

        @pl.when(fully_valid)
        def _():
            accumulate(d)

        @pl.when(jnp.logical_not(fully_valid))
        def _():
            row = tile_idx * tile_rows + jax.lax.broadcasted_iota(
                jnp.int32, d.shape, 0)
            accumulate(jnp.where(row < valid_rows, d, 0.0))
    else:
        accumulate(d)

    @pl.when(k == pl.num_programs(1) - 1)
    def _():
        # Single cross-lane reduce per split, written to the SMEM partial.
        out_ref[0, 0] = jnp.sum(acc_ref[...])


def grid_cell_loss(generated_images: jax.Array, targets: jax.Array,
                   *, max_tile_rows=None) -> jax.Array:
    """Pallas implementation of GridCellLoss.forward (weight_fn=None)."""
    assert generated_images.shape == targets.shape
    assert generated_images.ndim == 5, "expected (B, T, C, H, W)"
    B, T, C, H, W = targets.shape
    numel = B * T * C * H * W

    # Flatten to a lane-dense slab. Reshape of a contiguous array is a bitcast
    # (no HBM copy). Original dtypes are passed straight through.
    g_flat = generated_images.reshape(-1)
    t_flat = targets.reshape(-1)
    if numel % LANES != 0:
        # TODO(synk): rare ragged case (numel not a multiple of 128) pads - and
        # therefore copies - both operands; zero-padded diffs contribute 0.
        pad = LANES - numel % LANES
        g_flat = jnp.pad(g_flat, (0, pad))
        t_flat = jnp.pad(t_flat, (0, pad))
    rows = g_flat.shape[0] // LANES
    g2 = g_flat.reshape(rows, LANES)
    t2 = t_flat.reshape(rows, LANES)

    sublane = max(_sublane(g2.dtype), _sublane(t2.dtype))
    g_bytes = jnp.dtype(g2.dtype).itemsize
    t_bytes = jnp.dtype(t2.dtype).itemsize
    row_bytes = (g_bytes + t_bytes) * LANES          # HBM bytes per row per step

    # Per-generation VMEM budget: request up to 32 MiB scoped VMEM (at most
    # half the physical VMEM on every generation) and size the double-buffered
    # input blocks against ~2/3 of it; cap HBM traffic per step at ~8 MiB.
    try:
        vmem_cap = int(pltpu.get_tpu_info().vmem_capacity_bytes)
    except Exception:
        vmem_cap = 64 * 1024 * 1024                  # conservative (v7x physical)
    vmem_limit = min(VMEM_LIMIT_CAP, vmem_cap // 2)
    pipeline_budget = (2 * vmem_limit) // 3          # 2 buffers per input
    max_rows_vmem = max(sublane, pipeline_budget // (2 * row_bytes))
    max_rows_hbm = max(sublane, MAX_STEP_HBM_BYTES // row_bytes)
    tile_rows = min(max_rows_vmem, max_rows_hbm, _round_up(rows, sublane))
    if max_tile_rows is not None:                    # test hook / manual override
        tile_rows = min(tile_rows, max_tile_rows)
    tile_rows = max(sublane, (tile_rows // sublane) * sublane)

    total_tiles = pl.cdiv(rows, tile_rows)
    n_split = max(1, min(N_SPLIT, total_tiles))
    tiles_per_split = pl.cdiv(total_tiles, n_split)
    needs_mask = (n_split * tiles_per_split * tile_rows) != rows
    last_tile = total_tiles - 1

    def in_map(c, k):
        # Clamp so no block origin is fully out of bounds; out-of-range nominal
        # tiles are zero-masked inside the kernel.
        return (jnp.minimum(c * tiles_per_split + k, last_tile), 0)

    kernel = functools.partial(
        _grid_cell_loss_kernel,
        tile_rows=tile_rows,
        tiles_per_split=tiles_per_split,
        valid_rows=rows,
        needs_mask=needs_mask,
    )

    partials = pl.pallas_call(
        kernel,
        out_shape=jax.ShapeDtypeStruct((n_split, 1), jnp.float32),
        grid_spec=pltpu.PrefetchScalarGridSpec(
            num_scalar_prefetch=0,
            grid=(n_split, tiles_per_split),
            in_specs=[
                pl.BlockSpec((tile_rows, LANES), in_map),
                pl.BlockSpec((tile_rows, LANES), in_map),
            ],
            out_specs=pl.BlockSpec((1, 1), lambda c, k: (c, 0),
                                   memory_space=pltpu.SMEM),
            scratch_shapes=[pltpu.VMEM((8, LANES), jnp.float32)],
        ),
        compiler_params=pltpu.CompilerParams(
            dimension_semantics=("parallel", "arbitrary"),
            vmem_limit_bytes=vmem_limit,
        ),
    )(g2, t2)

    total = jnp.sum(partials)
    # Matches: difference /= T * H * W ; return difference.mean()
    # Applied as two factors for better f32 conditioning at huge sizes.
    return (total / jnp.float32(numel)) / jnp.float32(T * H * W)


def grid_cell_loss_ref(generated_images, targets):
    """Plain-JAX reference mirroring the PyTorch forward."""
    B, T, C, H, W = targets.shape
    diff = (generated_images.astype(jnp.float32)
            - targets.astype(jnp.float32))
    diff = diff / (T * H * W)
    return jnp.mean(diff)


if __name__ == "__main__":
    key = jax.random.PRNGKey(0)
    k1, k2 = jax.random.split(key)

    # Main test: small (B, T, C, H, W) future-frame tensors, f32 fast path.
    B, T, C, H, W = 2, 8, 4, 16, 16
    generated = jax.random.normal(k1, (B, T, C, H, W), dtype=jnp.float32)
    targets = jax.random.normal(k2, (B, T, C, H, W), dtype=jnp.float32)

    out = grid_cell_loss(generated, targets)
    out = jax.block_until_ready(out)
    ref = grid_cell_loss_ref(generated, targets)
    assert jnp.allclose(out, ref, atol=1e-6, rtol=1e-5), (out, ref)

    # Ragged / multi-split path: forces small tiles so both the parallel split
    # and the pl.when-gated boundary mask branch get compiled and exercised.
    B2, T2, C2 = 2, 5, 3
    g_r = jax.random.normal(k1, (B2, T2, C2, H, W), dtype=jnp.float32)
    t_r = jax.random.normal(k2, (B2, T2, C2, H, W), dtype=jnp.float32)
    out_r = jax.block_until_ready(grid_cell_loss(g_r, t_r, max_tile_rows=16))
    ref_r = grid_cell_loss_ref(g_r, t_r)
    assert jnp.allclose(out_r, ref_r, atol=1e-6, rtol=1e-5), (out_r, ref_r)

    # bf16 path: no wrapper upcast, cast happens on the VPU inside the kernel.
    g_bf = generated.astype(jnp.bfloat16)
    t_bf = targets.astype(jnp.bfloat16)
    out_bf = jax.block_until_ready(grid_cell_loss(g_bf, t_bf))
    ref_bf = grid_cell_loss_ref(g_bf, t_bf)
    assert jnp.allclose(out_bf, ref_bf, atol=1e-6, rtol=1e-5), (out_bf, ref_bf)

    # TODO(synk): weight_fn is None by default in the module; a user-supplied
    # weight_fn would need an extra elementwise stage and is not modeled.
    print("KERNEL_OK")
</pallas_src>

<mosaic_0001>
module attributes {stable_mosaic.version = 11 : i64} {
  func.func @_grid_cell_loss_kernel(%arg0: i32, %arg1: i32, %arg2: memref<128x128xf32, #tpu.memory_space<vmem>>, %arg3: memref<128x128xf32, #tpu.memory_space<vmem>>, %arg4: memref<1x1xf32, #tpu.memory_space<smem>>, %arg5: memref<8x128xf32, #tpu.memory_space<vmem>>) attributes {dimension_semantics = [#tpu.dimension_semantics<parallel>, #tpu.dimension_semantics<arbitrary>], iteration_bounds = array<i64: 1, 1>, scalar_prefetch = 0 : i64, scratch_operands = 1 : i64, tpu.core_type = #tpu.core_type<tc>, window_params = [{transform_indices = @transform_0, window_bounds = array<i64: 128, 128>}, {transform_indices = @transform_1, window_bounds = array<i64: 128, 128>}, {transform_indices = @transform_2, window_bounds = array<i64: 1, 1>}]} {
    %c0_i32 = arith.constant 0 : i32
    %0 = arith.cmpi eq, %arg1, %c0_i32 : i32
    %1 = arith.extui %0 : i1 to i32
    %c0_i32_0 = arith.constant 0 : i32
    %2 = arith.cmpi ne, %1, %c0_i32_0 : i32
    scf.if %2 {
      %cst_10 = arith.constant 0.000000e+00 : f32
      %14 = vector.broadcast %cst_10 : f32 to vector<8x128xf32>
      %c0_11 = arith.constant 0 : index
      %c0_12 = arith.constant 0 : index
      %15 = vector.load %arg5[%c0_11, %c0_12] : memref<8x128xf32, #tpu.memory_space<vmem>>, vector<8x128xf32>
      tpu.vector_store %arg5[%c0_11, %c0_12], %14 {strides = array<i32>} : memref<8x128xf32, #tpu.memory_space<vmem>>, vector<8x128xf32>,
    } else {
    }
    %c0 = arith.constant 0 : index
    %c0_1 = arith.constant 0 : index
    %3 = vector.load %arg2[%c0, %c0_1] : memref<128x128xf32, #tpu.memory_space<vmem>>, vector<128x128xf32>
    %c0_2 = arith.constant 0 : index
    %c0_3 = arith.constant 0 : index
    %4 = vector.load %arg3[%c0_2, %c0_3] : memref<128x128xf32, #tpu.memory_space<vmem>>, vector<128x128xf32>
    %5 = arith.subf %3, %4 : vector<128x128xf32>
    %c0_4 = arith.constant 0 : index
    %c0_5 = arith.constant 0 : index
    %6 = vector.load %arg5[%c0_4, %c0_5] : memref<8x128xf32, #tpu.memory_space<vmem>>, vector<8x128xf32>
    %7 = vector.shape_cast %5 : vector<128x128xf32> to vector<16x8x128xf32>
    %cst = arith.constant dense<0.000000e+00> : vector<8x128xf32>
    %8 = vector.multi_reduction <add>, %7, %cst [0] : vector<16x8x128xf32> to vector<8x128xf32>
    %9 = arith.addf %6, %8 : vector<8x128xf32>
    %c0_6 = arith.constant 0 : index
    %c0_7 = arith.constant 0 : index
    %10 = vector.load %arg5[%c0_6, %c0_7] : memref<8x128xf32, #tpu.memory_space<vmem>>, vector<8x128xf32>
    tpu.vector_store %arg5[%c0_6, %c0_7], %9 {strides = array<i32>} : memref<8x128xf32, #tpu.memory_space<vmem>>, vector<8x128xf32>,
    %c0_i32_8 = arith.constant 0 : i32
    %11 = arith.cmpi eq, %arg1, %c0_i32_8 : i32
    %12 = arith.extui %11 : i1 to i32
    %c0_i32_9 = arith.constant 0 : i32
    %13 = arith.cmpi ne, %12, %c0_i32_9 : i32
    scf.if %13 {
      %c0_10 = arith.constant 0 : index
      %c0_11 = arith.constant 0 : index
      %14 = vector.load %arg5[%c0_10, %c0_11] : memref<8x128xf32, #tpu.memory_space<vmem>>, vector<8x128xf32>
      %15 = vector.shape_cast %14 : vector<8x128xf32> to vector<1x8x128xf32>
      %cst_12 = arith.constant dense<0.000000e+00> : vector<1xf32>
      %16 = vector.multi_reduction <add>, %15, %cst_12 [1, 2] : vector<1x8x128xf32> to vector<1xf32>
      %17 = vector.shape_cast %16 : vector<1xf32> to vector<1x1x1xf32>
      %18 = vector.extract %17[0, 0, 0] : f32 from vector<1x1x1xf32>
      %c0_13 = arith.constant 0 : index
      %c0_14 = arith.constant 0 : index
      %19 = memref.load %arg4[%c0_13, %c0_14] : memref<1x1xf32, #tpu.memory_space<smem>>
      memref.store %18, %arg4[%c0_13, %c0_14] : memref<1x1xf32, #tpu.memory_space<smem>>
    } else {
    }
    return
  }
  func.func @transform_0(%arg0: i32, %arg1: i32) -> (i32, i32) {
    %c1_i32 = arith.constant 1 : i32
    %0 = arith.muli %arg0, %c1_i32 : i32
    %1 = arith.addi %0, %arg1 : i32
    %c0_i32 = arith.constant 0 : i32
    %2 = arith.minsi %1, %c0_i32 : i32
    %c0_i32_0 = arith.constant 0 : i32
    %c0_i32_1 = arith.constant 0 : i32
    return %2, %c0_i32_0 : i32, i32
  }
  func.func @transform_1(%arg0: i32, %arg1: i32) -> (i32, i32) {
    %c1_i32 = arith.constant 1 : i32
    %0 = arith.muli %arg0, %c1_i32 : i32
    %1 = arith.addi %0, %arg1 : i32
    %c0_i32 = arith.constant 0 : i32
    %2 = arith.minsi %1, %c0_i32 : i32
    %c0_i32_0 = arith.constant 0 : i32
    %c0_i32_1 = arith.constant 0 : i32
    return %2, %c0_i32_0 : i32, i32
  }
  func.func @transform_2(%arg0: i32, %arg1: i32) -> (i32, i32) {
    %c0_i32 = arith.constant 0 : i32
    %c0_i32_0 = arith.constant 0 : i32
    return %arg0, %c0_i32 : i32, i32
  }
}

</mosaic_0001>

<bundles_post_ra>
// kernel: tpu_custom_call.1
= control target key start
LH: loop header
LB: loop body
LE: loop exit
PB: predicated region body
PF: predicated region fallthrough
CT: control target
= control target key end

     0   :  { %7 = vsyncpa [#allocation4], 0  ;;  %s255_s0 = inlined_call_operand.hbm [shape: f32[128,128], index: 0, kind: input, shape index: {}]   ;;  %s256_s1 = inlined_call_operand.hbm [shape: f32[128,128], index: 1, kind: input, shape index: {}]   ;;  %s257_s2 = inlined_call_operand.hbm [shape: f32[1,1], index: 2, kind: output, shape index: {}]  }
   0x1   :  { %8 = vsyncpa [#allocation7], 0 }
   0x2   :  { %9 = vsyncpa [#allocation5], 0  ;;  %s226_s9 = smov [#allocation3]  }
   0x3   :  { %s21_s10 = sshll.u32 %s226_s9, 4  ;;  %s22_s10 = int_to_ptr.vmem [resolvable:$true] %s21_s10 }
   0x4   :  { %s180_s11 = scalar_lea.vmem %s22_s10, 2048  ;;  %p185_p1 = scmp.lt.s32.totalorder %s22_s10, %s22_s10 }
   0x5   :  { %p181_p0 = scmp.ne.s32.totalorder %s22_s10, %s180_s11  ;;  %p186_p2 = scmp.lt.s32.totalorder %s180_s11, %s180_s11 }
   0x7   :  { %p187_p3 = por %p186_p2, %p185_p1 }
   0x9   :  { %p188_p4 = pnand %p187_p3, %p181_p0 }
   0xb   :  { %191 = shalt.err (!%p188_p4)
}
   0xc   :  { %s227_s12 = smov 128   ;;  %s228_s13 = smov 8  }
   0xd   :  { %27 = dma.hbm_to_vmem [thread:$0]  %s255_s0, 2048, %s22_s10, [#allocation4], %s227_s12, %s227_s12, %s228_s13  }
   0xe   :  { %s229_s16 = smov [#allocation6]  }
   0xf   :  { %s39_s17 = sshll.u32 %s229_s16, 4  ;;  %s40_s17 = int_to_ptr.vmem [resolvable:$true] %s39_s17 }
  0x10   :  { %s200_s18 = scalar_lea.vmem %s40_s17, 2048  ;;  %p205_p6 = scmp.lt.s32.totalorder %s40_s17, %s40_s17 }
  0x11   :  { %p201_p5 = scmp.ne.s32.totalorder %s40_s17, %s200_s18  ;;  %p206_p7 = scmp.lt.s32.totalorder %s200_s18, %s200_s18 }
  0x13   :  { %p207_p8 = por %p206_p7, %p205_p6 }
  0x15   :  { %p208_p9 = pnand %p207_p8, %p201_p5 }
  0x17   :  { %211 = shalt.err (!%p208_p9)
}
  0x18   :  { %45 = dma.hbm_to_vmem [thread:$0]  %s256_s1, 2048, %s40_s17, [#allocation7], %s227_s12, %s227_s12, %s228_s13  }
  0x19   :  { %220 = dma.done.wait [#allocation4], 2048  }
  0x1a   :  { %221 = vsyncadd [#allocation4], 4294965248 }
  0x1b   :  { %222 = dma.done.wait [#allocation7], 2048  }
  0x1c   :  { %223 = vsyncadd [#allocation7], 4294965248  ;;  %v65_v0 = vld [vmem:[#allocation3] sm:$0xff]  ;;  %v66_v1 = vld [vmem:[#allocation3 + $0x8] sm:$0xff]  ;;  %s230_s1 = smov [#allocation8]  }
  0x1d   :  { %v67_v2 = vld [vmem:[#allocation3 + $0x10] sm:$0xff]  ;;  %v68_v3 = vld [vmem:[#allocation3 + $0x18] sm:$0xff]  ;;  %v81_v4 = vld [vmem:[#allocation6] sm:$0xff] }
  0x1e   :  { %v82_v5 = vld [vmem:[#allocation6 + $0x8] sm:$0xff]  ;;  %v83_v6 = vld [vmem:[#allocation6 + $0x10] sm:$0xff]  ;;  %v84_v7 = vld [vmem:[#allocation6 + $0x18] sm:$0xff]  ;;  %v97_v8 = vsub.f32 %v65_v0, %v81_v4 }
  0x1f   :  { %v98_v9 = vsub.f32 %v66_v1, %v82_v5  ;;  %v69_v10 = vld [vmem:[#allocation3 + $0x20] sm:$0xff]  ;;  %v99_v12 = vsub.f32 %v67_v2, %v83_v6  ;;  %v100_v13 = vsub.f32 %v68_v3, %v84_v7  ;;  %v70_v15 = vld [vmem:[#allocation3 + $0x28] sm:$0xff]  ;;  %v71_v19 = vld [vmem:[#allocation3 + $0x30] sm:$0xff] }
  0x20   :  { %v85_v11 = vld [vmem:[#allocation6 + $0x20] sm:$0xff]  ;;  %v86_v16 = vld [vmem:[#allocation6 + $0x28] sm:$0xff]  ;;  %v87_v20 = vld [vmem:[#allocation6 + $0x30] sm:$0xff] }
  0x21   :  { %v114_v14 = vadd.f32 %v98_v9, %v97_v8  ;;  %v101_v17 = vsub.f32 %v69_v10, %v85_v11  ;;  %v102_v21 = vsub.f32 %v70_v15, %v86_v16  ;;  %v72_v23 = vld [vmem:[#allocation3 + $0x38] sm:$0xff]  ;;  %v103_v25 = vsub.f32 %v71_v19, %v87_v20  ;;  %v73_v27 = vld [vmem:[#allocation3 + $0x40] sm:$0xff]  ;;  %v74_v31 = vld [vmem:[#allocation3 + $0x48] sm:$0xff] }
  0x22   :  { %v88_v24 = vld [vmem:[#allocation6 + $0x38] sm:$0xff]  ;;  %v89_v28 = vld [vmem:[#allocation6 + $0x40] sm:$0xff]  ;;  %v90_v32 = vld [vmem:[#allocation6 + $0x48] sm:$0xff] }
  0x23   :  { %v115_v18 = vadd.f32 %v114_v14, %v99_v12  ;;  %v104_v29 = vsub.f32 %v72_v23, %v88_v24  ;;  %v105_v33 = vsub.f32 %v73_v27, %v89_v28  ;;  %v75_v35 = vld [vmem:[#allocation3 + $0x50] sm:$0xff]  ;;  %v106_v37 = vsub.f32 %v74_v31, %v90_v32  ;;  %v76_v39 = vld [vmem:[#allocation3 + $0x58] sm:$0xff]  ;;  %v77_v43 = vld [vmem:[#allocation3 + $0x60] sm:$0xff] }
  0x24   :  { %v91_v36 = vld [vmem:[#allocation6 + $0x50] sm:$0xff]  ;;  %v92_v40 = vld [vmem:[#allocation6 + $0x58] sm:$0xff]  ;;  %v93_v44 = vld [vmem:[#allocation6 + $0x60] sm:$0xff] }
  0x25   :  { %v116_v22 = vadd.f32 %v115_v18, %v100_v13  ;;  %v107_v41 = vsub.f32 %v75_v35, %v91_v36  ;;  %v108_v45 = vsub.f32 %v76_v39, %v92_v40  ;;  %v78_v47 = vld [vmem:[#allocation3 + $0x68] sm:$0xff]  ;;  %v109_v49 = vsub.f32 %v77_v43, %v93_v44  ;;  %v79_v51 = vld [vmem:[#allocation3 + $0x70] sm:$0xff]  ;;  %v80_v55 = vld [vmem:[#allocation3 + $0x78] sm:$0xff] }
  0x26   :  { %v94_v48 = vld [vmem:[#allocation6 + $0x68] sm:$0xff]  ;;  %v95_v52 = vld [vmem:[#allocation6 + $0x70] sm:$0xff]  ;;  %v96_v56 = vld [vmem:[#allocation6 + $0x78] sm:$0xff] }
  0x27   :  { %v117_v26 = vadd.f32 %v116_v22, %v101_v17  ;;  %v110_v53 = vsub.f32 %v78_v47, %v94_v48  ;;  %v111_v57 = vsub.f32 %v79_v51, %v95_v52  ;;  %v112_v59 = vsub.f32 %v80_v55, %v96_v56 }
  0x29   :  { %v118_v30 = vadd.f32 %v117_v26, %v102_v21 }
  0x2b   :  { %v119_v34 = vadd.f32 %v118_v30, %v103_v25 }
  0x2d   :  { %v120_v38 = vadd.f32 %v119_v34, %v104_v29 }
  0x2f   :  { %v121_v42 = vadd.f32 %v120_v38, %v105_v33 }
  0x31   :  { %v122_v46 = vadd.f32 %v121_v42, %v106_v37 }
  0x33   :  { %v123_v50 = vadd.f32 %v122_v46, %v107_v41 }
  0x35   :  { %v124_v54 = vadd.f32 %v123_v50, %v108_v45 }
  0x37   :  { %v125_v58 = vadd.f32 %v124_v54, %v109_v49 }
  0x39   :  { %v126_v60 = vadd.f32 %v125_v58, %v110_v53 }
  0x3b   :  { %v127_v61 = vadd.f32 %v126_v60, %v111_v57 }
  0x3d   :  { %v128_v62 = vadd.f32 %v127_v61, %v112_v59 }
  0x3f   :  { %135 = vadd.xlane.f32.xlu0 %v128_v62 }
  0xc8   :  { %v136_v63 = vpop.xlane.xlu0 %135 }
  0xc9   :  { %v137_v0 = vrot.slane %v136_v63, 4 }
  0xcb   :  { %v138_v1 = vadd.f32 %v137_v0, %v136_v63 }
  0xcd   :  { %v139_v2 = vrot.slane %v138_v1, 2 }
  0xcf   :  { %v140_v3 = vadd.f32 %v139_v2, %v138_v1 }
  0xd1   :  { %v141_v4 = vrot.slane %v140_v3, 1 }
  0xd3   :  { %v142_v5 = vadd.f32 %v141_v4, %v140_v3 }
  0xd5   :  { %165 = vpush %v142_v5 }
 0x106   :  { %s166_s0 = spop %165 }
 0x107   :  { %145 = sst [smem:[#allocation8]] %s166_s0 }
 0x108   :  { %153 = dma.smem_to_hbm %s230_s1, 16, %s257_s2, [#allocation5]  }
 0x109   :  { %224 = dma.done.wait [#allocation5], 16  }
 0x10a   :  { %225 = vsyncadd [#allocation5], 4294967280 }
 0x10b   :  { %157 = sfence }
 0x10c   :  { %158 = vsyncpa [#allocation4], 1 }
 0x10d   :  { %159 = vsyncpa [#allocation7], 1 }
 0x10e   :  { %160 = vsyncpa [#allocation5], 1 }

</bundles_post_ra>
